<compile_context>
chip_gen: v7x
topology: tpu7x:2x2x1
jax: 0.10.0
libtpu: 0.0.40
codegen_flags: <defaults>
</compile_context>

<pallas_src>
import functools

import jax
import jax.numpy as jnp
from jax.experimental import pallas as pl
from jax.experimental.pallas import tpu as pltpu


_HP = 128  # padded hidden width for both hidden layers (64 -> 128, 32 -> 128)


def _round_up(n, m):
    return ((n + m - 1) // m) * m


def _pad2d(a, rows, cols):
    r, c = a.shape
    if r == rows and c == cols:
        return a
    return jnp.pad(a, ((0, rows - r), (0, cols - c)))


def _gate_kernel(x_ref, w1_ref, b1_ref, w2_ref, b2_ref, w3_ref, b3_ref, o_ref):
    # in-kernel bf16 cast of the f32 input (saves a wrapper-side HBM pass)
    x = x_ref[...].astype(jnp.bfloat16)
    # layer 1: [tb, F] @ [F, 128] -> f32 acc, + bias, ReLU (f32)
    h1 = jnp.dot(x, w1_ref[...], preferred_element_type=jnp.float32)
    h1 = jnp.maximum(h1 + b1_ref[...], 0.0)
    # layer 2: [tb, 128] @ [128, 128]
    h2 = jnp.dot(h1.astype(jnp.bfloat16), w2_ref[...],
                 preferred_element_type=jnp.float32)
    h2 = jnp.maximum(h2 + b2_ref[...], 0.0)
    # layer 3 (logits): [tb, 128] @ [128, E] + bias; E stays unpadded
    out = jnp.dot(h2.astype(jnp.bfloat16), w3_ref[...],
                  preferred_element_type=jnp.float32) + b3_ref[...]
    o_ref[...] = out.astype(o_ref.dtype)


def pack_gate_params(params):
    """One-time packing: pad hidden dims to 128 lanes, cast weights to bf16.

    params: w1 [F,64], b1 [1,64], w2 [64,32], b2 [1,32], w3 [32,E], b3 [1,E]
    (weights stored as PyTorch weight.T).  Padding with zeros is exact because
    padded bias lanes are zero and ReLU(0) = 0.
    """
    F = params["w1"].shape[0]
    E = params["w3"].shape[1]
    return {
        "w1": _pad2d(params["w1"], F, _HP).astype(jnp.bfloat16),    # [F, 128]
        "b1": _pad2d(params["b1"], 1, _HP).astype(jnp.float32),     # [1, 128]
        "w2": _pad2d(params["w2"], _HP, _HP).astype(jnp.bfloat16),  # [128, 128]
        "b2": _pad2d(params["b2"], 1, _HP).astype(jnp.float32),     # [1, 128]
        "w3": _pad2d(params["w3"], _HP, E).astype(jnp.bfloat16),    # [128, E]
        "b3": params["b3"].astype(jnp.float32),                     # [1, E]
    }


def _pick_tb(B, F, block_b):
    """Batch tile: target ~2 MiB of f32 input per tile; split small batches in
    two so the grid has >= 2 steps for the v7x dual-TensorCore case."""
    rows_for_2mib = (2 * 1024 * 1024) // max(F * 4, 1)
    tb = max(256, min(block_b, _round_up(max(rows_for_2mib, 1), 128)))
    if B <= tb:
        half = -(-B // 2)                 # cdiv(B, 2)
        tb = max(8, _round_up(half, 8))   # sublane-aligned, <= round_up(B, 8)
    return tb


@functools.partial(jax.jit, static_argnames=("block_b",))
def gate_forward(x, packed, block_b=2048):
    """Gate MLP forward pass.

    x:      [B, input_size] float32 (cast to bf16 inside the kernel)
    packed: output of pack_gate_params
    returns [B, num_experts] float32 raw logits (no softmax)
    """
    B, F = x.shape
    E = packed["w3"].shape[1]

    tb = _pick_tb(B, F, block_b)
    grid = (pl.cdiv(B, tb),)

    # VMEM budget: double-buffered x tile (f32) + double-buffered out tile (f32)
    # + resident bf16 weights / f32 biases, with generous headroom (>= 16 MiB,
    # the v5e scoped default; capped at 64 MiB for v7x physical VMEM).
    vmem_bytes = (
        2 * tb * F * 4
        + 2 * tb * E * 4
        + (F * _HP + _HP * _HP + _HP * E) * 2
        + (2 * _HP + E) * 4
    )
    vmem_limit = int(min(64 * 1024 * 1024,
                         max(16 * 1024 * 1024, 2 * vmem_bytes + (2 << 20))))

    resident = pl.BlockSpec(memory_space=pltpu.MemorySpace.VMEM)

    out = pl.pallas_call(
        _gate_kernel,
        out_shape=jax.ShapeDtypeStruct((B, E), jnp.float32),
        grid_spec=pltpu.PrefetchScalarGridSpec(
            num_scalar_prefetch=0,
            grid=grid,
            in_specs=[
                pl.BlockSpec((tb, F), lambda i: (i, 0)),  # x tile over batch
                resident, resident,                        # layer 1 params
                resident, resident,                        # layer 2 params
                resident, resident,                        # layer 3 params
            ],
            out_specs=pl.BlockSpec((tb, E), lambda i: (i, 0)),
        ),
        compiler_params=pltpu.CompilerParams(
            dimension_semantics=("parallel",),
            vmem_limit_bytes=vmem_limit,
        ),
    )(x, packed["w1"], packed["b1"], packed["w2"], packed["b2"],
      packed["w3"], packed["b3"])
    return out


def init_gate_params(key, input_size, num_experts):
    """Deterministic init matching nn.Linear default (U(-1/sqrt(in), 1/sqrt(in)))."""
    dims = [(input_size, 64), (64, 32), (32, num_experts)]
    params = {}
    for idx, (fan_in, fan_out) in enumerate(dims, start=1):
        key, kw, kb = jax.random.split(key, 3)
        bound = 1.0 / jnp.sqrt(fan_in)
        # stored as [in, out] == PyTorch weight.T
        params[f"w{idx}"] = jax.random.uniform(
            kw, (fan_in, fan_out), jnp.float32, -bound, bound)
        params[f"b{idx}"] = jax.random.uniform(
            kb, (1, fan_out), jnp.float32, -bound, bound)
    return params


def gate_reference(x, params):
    """Pure-JAX f32 reference of the same forward pass."""
    h = jnp.maximum(x @ params["w1"] + params["b1"], 0.0)
    h = jnp.maximum(h @ params["w2"] + params["b2"], 0.0)
    return h @ params["w3"] + params["b3"]


if __name__ == "__main__":
    key = jax.random.PRNGKey(0)
    k_x, k_p = jax.random.split(key)

    batch = 64
    input_size = 32
    num_experts = 4

    x = jax.random.normal(k_x, (batch, input_size), jnp.float32)
    params = init_gate_params(k_p, input_size, num_experts)
    packed = jax.tree_util.tree_map(jax.block_until_ready, pack_gate_params(params))

    out = gate_forward(x, packed)
    out = jax.block_until_ready(out)

    ref = gate_reference(x, params)
    assert out.shape == (batch, num_experts)
    # bf16 MXU inputs with f32 accumulation -> compare against f32 reference
    # with a bf16-appropriate tolerance.
    assert jnp.allclose(out, ref, atol=3e-2, rtol=3e-2), "mismatch vs reference"

    print("KERNEL_OK")
</pallas_src>

<mosaic_0001>
module attributes {stable_mosaic.version = 11 : i64} {
  func.func @_gate_kernel(%arg0: i32, %arg1: memref<32x32xf32, #tpu.memory_space<vmem>>, %arg2: memref<32x128xbf16, #tpu.memory_space<vmem>>, %arg3: memref<1x128xf32, #tpu.memory_space<vmem>>, %arg4: memref<128x128xbf16, #tpu.memory_space<vmem>>, %arg5: memref<1x128xf32, #tpu.memory_space<vmem>>, %arg6: memref<128x4xbf16, #tpu.memory_space<vmem>>, %arg7: memref<1x4xf32, #tpu.memory_space<vmem>>, %arg8: memref<32x4xf32, #tpu.memory_space<vmem>>) attributes {dimension_semantics = [#tpu.dimension_semantics<parallel>], iteration_bounds = array<i64: 2>, scalar_prefetch = 0 : i64, scratch_operands = 0 : i64, tpu.core_type = #tpu.core_type<tc>, window_params = [{transform_indices = @transform_0, window_bounds = array<i64: 32, 32>}, {pipeline_mode = #tpu.pipeline_mode<synchronous>, transform_indices = @transform_1, window_bounds = array<i64: 32, 128>}, {pipeline_mode = #tpu.pipeline_mode<synchronous>, transform_indices = @transform_2, window_bounds = array<i64: 1, 128>}, {pipeline_mode = #tpu.pipeline_mode<synchronous>, transform_indices = @transform_3, window_bounds = array<i64: 128, 128>}, {pipeline_mode = #tpu.pipeline_mode<synchronous>, transform_indices = @transform_4, window_bounds = array<i64: 1, 128>}, {pipeline_mode = #tpu.pipeline_mode<synchronous>, transform_indices = @transform_5, window_bounds = array<i64: 128, 4>}, {pipeline_mode = #tpu.pipeline_mode<synchronous>, transform_indices = @transform_6, window_bounds = array<i64: 1, 4>}, {transform_indices = @transform_7, window_bounds = array<i64: 32, 4>}]} {
    %c0 = arith.constant 0 : index
    %c0_0 = arith.constant 0 : index
    %0 = vector.load %arg1[%c0, %c0_0] : memref<32x32xf32, #tpu.memory_space<vmem>>, vector<32x32xf32>
    %1 = arith.truncf %0 : vector<32x32xf32> to vector<32x32xbf16>
    %c0_1 = arith.constant 0 : index
    %c0_2 = arith.constant 0 : index
    %2 = vector.load %arg2[%c0_1, %c0_2] : memref<32x128xbf16, #tpu.memory_space<vmem>>, vector<32x128xbf16>
    %cst = arith.constant dense<0.000000e+00> : vector<32x128xf32>
    %3 = tpu.matmul %1, %2, %cst {dimension_numbers = #tpu.dot_dimension_numbers<[1], [0], [0], [1], [0, 0, 1, 1], [], []>} : vector<32x32xbf16>, vector<32x128xbf16>, vector<32x128xf32> -> vector<32x128xf32>
    %c0_3 = arith.constant 0 : index
    %c0_4 = arith.constant 0 : index
    %4 = vector.load %arg3[%c0_3, %c0_4] : memref<1x128xf32, #tpu.memory_space<vmem>>, vector<1x128xf32>
    %5 = vector.broadcast %4 : vector<1x128xf32> to vector<32x128xf32>
    %6 = arith.addf %3, %5 : vector<32x128xf32>
    %cst_5 = arith.constant 0.000000e+00 : f32
    %7 = vector.broadcast %cst_5 : f32 to vector<32x128xf32>
    %8 = arith.maximumf %6, %7 : vector<32x128xf32>
    %9 = arith.truncf %8 : vector<32x128xf32> to vector<32x128xbf16>
    %c0_6 = arith.constant 0 : index
    %c0_7 = arith.constant 0 : index
    %10 = vector.load %arg4[%c0_6, %c0_7] : memref<128x128xbf16, #tpu.memory_space<vmem>>, vector<128x128xbf16>
    %cst_8 = arith.constant dense<0.000000e+00> : vector<32x128xf32>
    %11 = tpu.matmul %9, %10, %cst_8 {dimension_numbers = #tpu.dot_dimension_numbers<[1], [0], [0], [1], [0, 0, 1, 1], [], []>} : vector<32x128xbf16>, vector<128x128xbf16>, vector<32x128xf32> -> vector<32x128xf32>
    %c0_9 = arith.constant 0 : index
    %c0_10 = arith.constant 0 : index
    %12 = vector.load %arg5[%c0_9, %c0_10] : memref<1x128xf32, #tpu.memory_space<vmem>>, vector<1x128xf32>
    %13 = vector.broadcast %12 : vector<1x128xf32> to vector<32x128xf32>
    %14 = arith.addf %11, %13 : vector<32x128xf32>
    %cst_11 = arith.constant 0.000000e+00 : f32
    %15 = vector.broadcast %cst_11 : f32 to vector<32x128xf32>
    %16 = arith.maximumf %14, %15 : vector<32x128xf32>
    %17 = arith.truncf %16 : vector<32x128xf32> to vector<32x128xbf16>
    %c0_12 = arith.constant 0 : index
    %c0_13 = arith.constant 0 : index
    %18 = vector.load %arg6[%c0_12, %c0_13] : memref<128x4xbf16, #tpu.memory_space<vmem>>, vector<128x4xbf16>
    %cst_14 = arith.constant dense<0.000000e+00> : vector<32x4xf32>
    %19 = tpu.matmul %17, %18, %cst_14 {dimension_numbers = #tpu.dot_dimension_numbers<[1], [0], [0], [1], [0, 0, 1, 1], [], []>} : vector<32x128xbf16>, vector<128x4xbf16>, vector<32x4xf32> -> vector<32x4xf32>
    %c0_15 = arith.constant 0 : index
    %c0_16 = arith.constant 0 : index
    %20 = vector.load %arg7[%c0_15, %c0_16] : memref<1x4xf32, #tpu.memory_space<vmem>>, vector<1x4xf32>
    %21 = vector.broadcast %20 : vector<1x4xf32> to vector<32x4xf32>
    %22 = arith.addf %19, %21 : vector<32x4xf32>
    %c0_17 = arith.constant 0 : index
    %c0_18 = arith.constant 0 : index
    %23 = vector.load %arg8[%c0_17, %c0_18] : memref<32x4xf32, #tpu.memory_space<vmem>>, vector<32x4xf32>
    tpu.vector_store %arg8[%c0_17, %c0_18], %22 {strides = array<i32>} : memref<32x4xf32, #tpu.memory_space<vmem>>, vector<32x4xf32>,
    return
  }
  func.func @transform_0(%arg0: i32) -> (i32, i32) {
    %c0_i32 = arith.constant 0 : i32
    %c0_i32_0 = arith.constant 0 : i32
    return %arg0, %c0_i32 : i32, i32
  }
  func.func @transform_1(%arg0: i32) -> (i32, i32) {
    %c0_i32 = arith.constant 0 : i32
    %c0_i32_0 = arith.constant 0 : i32
    %c0_i32_1 = arith.constant 0 : i32
    return %c0_i32, %c0_i32_0 : i32, i32
  }
  func.func @transform_2(%arg0: i32) -> (i32, i32) {
    %c0_i32 = arith.constant 0 : i32
    %c0_i32_0 = arith.constant 0 : i32
    %c0_i32_1 = arith.constant 0 : i32
    return %c0_i32, %c0_i32_0 : i32, i32
  }
  func.func @transform_3(%arg0: i32) -> (i32, i32) {
    %c0_i32 = arith.constant 0 : i32
    %c0_i32_0 = arith.constant 0 : i32
    %c0_i32_1 = arith.constant 0 : i32
    return %c0_i32, %c0_i32_0 : i32, i32
  }
  func.func @transform_4(%arg0: i32) -> (i32, i32) {
    %c0_i32 = arith.constant 0 : i32
    %c0_i32_0 = arith.constant 0 : i32
    %c0_i32_1 = arith.constant 0 : i32
    return %c0_i32, %c0_i32_0 : i32, i32
  }
  func.func @transform_5(%arg0: i32) -> (i32, i32) {
    %c0_i32 = arith.constant 0 : i32
    %c0_i32_0 = arith.constant 0 : i32
    %c0_i32_1 = arith.constant 0 : i32
    return %c0_i32, %c0_i32_0 : i32, i32
  }
  func.func @transform_6(%arg0: i32) -> (i32, i32) {
    %c0_i32 = arith.constant 0 : i32
    %c0_i32_0 = arith.constant 0 : i32
    %c0_i32_1 = arith.constant 0 : i32
    return %c0_i32, %c0_i32_0 : i32, i32
  }
  func.func @transform_7(%arg0: i32) -> (i32, i32) {
    %c0_i32 = arith.constant 0 : i32
    %c0_i32_0 = arith.constant 0 : i32
    return %arg0, %c0_i32 : i32, i32
  }
}

</mosaic_0001>

<bundles_post_ra>
// kernel: gate_forward.1
= control target key start
LH: loop header
LB: loop body
LE: loop exit
PB: predicated region body
PF: predicated region fallthrough
CT: control target
= control target key end

     0   :  { %s861_s24 = smov 0   ;;  %s948_s0 = inlined_call_operand.vmem [shape: f32[64,32], index: 0, kind: input, shape index: {}]   ;;  %s949_s1 = inlined_call_operand.vmem [shape: bf16[32,128], index: 1, kind: input, shape index: {}]   ;;  %s950_s2 = inlined_call_operand.vmem [shape: f32[1,128], index: 2, kind: input, shape index: {}]   ;;  %s951_s3 = inlined_call_operand.vmem [shape: bf16[128,128], index: 3, kind: input, shape index: {}]   ;;  %s952_s4 = inlined_call_operand.vmem [shape: f32[1,128], index: 4, kind: input, shape index: {}]   ;;  %s953_s5 = inlined_call_operand.vmem [shape: bf16[128,4], index: 5, kind: input, shape index: {}]   ;;  %s954_s6 = inlined_call_operand.vmem [shape: f32[1,4], index: 6, kind: input, shape index: {}]   ;;  %s955_s7 = inlined_call_operand.vmem [shape: f32[64,4], index: 7, kind: output, shape index: {}]  }
   0x1 LB: > { %s681_s25 = sadd.s32 4294967295, %s819_s24   ;;  %p685_p0 = scmp.ge.s32.totalorder %s819_s24, 1  ;;  %s819_s24 = sphi %s861_s24, %s17_s24  }
   0x2   : > { %p238_p1 = scmp.lt.s32.totalorder %s819_s24, 3 }
   0x4   : > { %p239_p2 = pnand %p685_p0, %p238_p1 }
   0x5   : > { %v795_v0 = vld [vmem:[%s949_s1] sm:$0xff] (!%p239_p2)   ;;  %s686_s28 = sshll.u32 (!%p239_p2), %s681_s25, 2  ;;  %v796_v1 = vld [vmem:[%s949_s1 + $0x8] sm:$0xff] (!%p239_p2)   ;;  %v799_v4 = vld [vmem:[%s951_s3 + $0x10] sm:$0xff] (!%p239_p2)   ;;  %vm312_vm0 = vcmask (!%p239_p2), 261120   ;;  %vm620_vm1 = vcmask (!%p239_p2), 31744  }
   0x6   : > { %242 = sbr.rel (%p239_p2) target bundleno = 682 (0x2aa), region = 48  ;;  %p271_p3 = scmp.lt.s32.totalorder (!%p239_p2), %s686_s28, 7  ;;  %739 = vmatprep.subr.bf16.mxu0 (!%p239_p2), %v795_v0  ;;  %v797_v2 = vld [vmem:[%s951_s3] sm:$0xff] (!%p239_p2)   ;;  %v798_v3 = vld [vmem:[%s951_s3 + $0x8] sm:$0xff] (!%p239_p2)   ;;  %v800_v11 = vld [vmem:[%s951_s3 + $0x18] sm:$0xff] (!%p239_p2)  }
   0x7   : > { %740 = vmatpush3.bf16.msra.mxu0 (!%p239_p2), %v795_v0  ;;  %747 = vmatprep.subr.bf16.mxu1 (!%p239_p2), %v797_v2  ;;  %v801_v12 = vld [vmem:[%s951_s3 + $0x20] sm:$0xff] (!%p239_p2)   ;;  %v802_v13 = vld [vmem:[%s951_s3 + $0x28] sm:$0xff] (!%p239_p2)   ;;  %v803_v14 = vld [vmem:[%s951_s3 + $0x30] sm:$0xff] (!%p239_p2)  }
   0x8   : > { %741 = vmatprep.subr.bf16.mxu0 (!%p239_p2), %v796_v1  ;;  %748 = vmatpush3.bf16.msra.mxu1 (!%p239_p2), %v797_v2  ;;  %v804_v15 = vld [vmem:[%s951_s3 + $0x38] sm:$0xff] (!%p239_p2)   ;;  %v805_v16 = vld [vmem:[%s953_s5] sm:$0xff] (!%p239_p2)   ;;  %v806_v17 = vld [vmem:[%s953_s5 + $0x8] sm:$0xff] (!%p239_p2)  }
   0x9   : > { %749 = vmatprep.subr.bf16.mxu1 (!%p239_p2), %v798_v3  ;;  %v807_v18 = vld [vmem:[%s953_s5 + $0x10] sm:$0xff] (!%p239_p2)   ;;  %v808_v19 = vld [vmem:[%s953_s5 + $0x18] sm:$0xff] (!%p239_p2)   ;;  %v809_v20 = vld [vmem:[%s953_s5 + $0x20] sm:$0xff] (!%p239_p2)  }
   0xa   : > { %v810_v21 = vld [vmem:[%s953_s5 + $0x28] sm:$0xff] (!%p239_p2)   ;;  %v690_v22 = vld [vmem:[%s950_s2] ss:$0 sm:$0xff] (!%p239_p2)  ;;  %v811_v37 = vld [vmem:[%s953_s5 + $0x30] sm:$0xff] (!%p239_p2)  }
   0xb   : > { %742 = vmatpush3.bf16.msra.mxu0 (!%p239_p2), %v796_v1  ;;  %v812_v38 = vld [vmem:[%s953_s5 + $0x38] sm:$0xff] (!%p239_p2)   ;;  %v695_v39 = vld [vmem:[%s952_s4] ss:$0 sm:$0xff] (!%p239_p2) }
   0xc   : > { %750 = vmatpush3.bf16.msra.mxu1 (!%p239_p2), %v798_v3  ;;  %767 = vmatprep.subr.bf16.mxu0 (!%p239_p2), %v805_v16  ;;  %v704_v54 = vld [vmem:[%s954_s6] ss:$0 sm:$0xff] (!%p239_p2) }
   0xd   : > { %s957_s28 = smov (!%p271_p3, %s686_s28), 7  ;;  %751 = vmatprep.subr.bf16.mxu1 %v799_v4 }
   0xe   : > { %s687_s12 = sshll.u32 %s957_s28, 3 }
   0xf   : > { %s274_s15 = scalar_lea.vmem %s948_s0, %s687_s12  ;;  %s280_s11 = scalar_lea.vmem %s955_s7, %s687_s12 }
  0x10   : > { %v283_v5 = vld [vmem:[%s274_s15] sm:$0xff]  ;;  %v284_v6 = vld [vmem:[%s274_s15 + $0x8] sm:$0xff]  ;;  %v285_v7 = vld [vmem:[%s274_s15 + $0x10] sm:$0xff]  ;;  %752 = vmatpush3.bf16.msra.mxu1 %v799_v4 }
  0x11   : > { %v287_v8 = vpack.c.bf16 %v284_v6, %v283_v5  ;;  %v286_v9 = vld [vmem:[%s274_s15 + $0x18] sm:$0xff]  ;;  %753 = vmatprep.subr.bf16.mxu1 %v800_v11 }
  0x12   : > { %v288_v10 = vpack.c.bf16 %v286_v9, %v285_v7 }
  0x13   : > { %743 = vmatprep.mubr.msk.bf16.mxu0 %vm312_vm0, %v287_v8 }
  0x14   : > { %744 = vmatmul.mubr.msk.bf16.vlgmr.msra.gmra.mrb[0].mxu0 %vm312_vm0, %v288_v10  ;;  %754 = vmatpush3.bf16.msra.mxu1 %v800_v11 }
  0x15   : > { %755 = vmatprep.subr.bf16.mxu1 %v801_v12  ;;  %768 = vmatpush3.bf16.msra.mxu0 %v805_v16 }
  0x16   : > { %769 = vmatprep.subr.bf16.mxu0 %v806_v17 }
  0x18   : > { %756 = vmatpush3.bf16.msra.mxu1 %v801_v12 }
  0x19   : > { %757 = vmatprep.subr.bf16.mxu1 %v802_v13  ;;  %770 = vmatpush3.bf16.msra.mxu0 %v806_v17 }
  0x1a   : > { %771 = vmatprep.subr.bf16.mxu0 %v807_v18 }
  0x1c   : > { %758 = vmatpush3.bf16.msra.mxu1 %v802_v13 }
  0x1d   : > { %759 = vmatprep.subr.bf16.mxu1 %v803_v14  ;;  %772 = vmatpush3.bf16.msra.mxu0 %v807_v18 }
  0x1e   : > { %773 = vmatprep.subr.bf16.mxu0 %v808_v19 }
  0x20   : > { %760 = vmatpush3.bf16.msra.mxu1 %v803_v14 }
  0x21   : > { %761 = vmatprep.subr.bf16.mxu1 %v804_v15  ;;  %774 = vmatpush3.bf16.msra.mxu0 %v808_v19 }
  0x22   : > { %775 = vmatprep.subr.bf16.mxu0 %v809_v20 }
  0x24   : > { %762 = vmatpush3.bf16.msra.mxu1 %v804_v15 }
  0x25   : > { %776 = vmatpush3.bf16.msra.mxu0 %v809_v20 }
  0x26   : > { %777 = vmatprep.subr.bf16.mxu0 %v810_v21 }
  0x29   : > { %778 = vmatpush3.bf16.msra.mxu0 %v810_v21 }
  0x2a   : > { %779 = vmatprep.subr.bf16.mxu0 %v811_v37 }
  0x2d   : > { %780 = vmatpush3.bf16.msra.mxu0 %v811_v37 }
  0x2e   : > { %781 = vmatprep.subr.bf16.mxu0 %v812_v38 }
  0x31   : > { %782 = vmatpush3.bf16.msra.mxu0 %v812_v38 }
  0xe7   : > { %v745_v23 = vpop.f32.mrb[0].mxu0 }
  0xe8   : > { %v362_v24 = vadd.f32 %v745_v23, %v690_v22  ;;  %v353_v25 = vpop.f32.mrb[1].mxu0 }
  0xe9   : > { %v354_v26 = vadd.f32 %v690_v22, %v353_v25  ;;  %v746_v27 = vpop.f32.mrb[2].mxu0 }
  0xea   : > { %v365_v28 = vadd.f32 %v746_v27, %v690_v22  ;;  %v356_v29 = vpop.f32.mrb[3].mxu0  ;;  %v370_v31 = vmax.f32 %v362_v24, 0.0 }
  0xeb   : > { %v357_v30 = vadd.f32 %v690_v22, %v356_v29  ;;  %v368_v33 = vmax.f32 %v354_v26, 0.0 }
  0xec   : > { %v371_v32 = vmax.f32 %v365_v28, 0.0 }
  0xed   : > { %v369_v34 = vmax.f32 %v357_v30, 0.0 }
  0xee   : > { %v373_v35 = vpack.c.bf16 %v371_v32, %v370_v31 }
  0xef   : > { %v372_v36 = vpack.c.bf16 %v369_v34, %v368_v33 }
  0xf1   : > { %763 = vmatprep.mubr.bf16.mxu1 %v372_v36 }
  0xf2   : > { %764 = vmatmul.mubr.bf16.vlgmr.msra.gmra.mrb[0].mxu1 %v373_v35 }
 0x1c5   : > { %v765_v40 = vpop.f32.mrb[0].mxu1 }
 0x1c6   : > { %v488_v41 = vadd.f32 %v765_v40, %v695_v39  ;;  %v479_v42 = vpop.f32.mrb[1].mxu1 }
 0x1c7   : > { %v480_v43 = vadd.f32 %v695_v39, %v479_v42  ;;  %v766_v44 = vpop.f32.mrb[2].mxu1 }
 0x1c8   : > { %v491_v45 = vadd.f32 %v766_v44, %v695_v39  ;;  %v482_v46 = vpop.f32.mrb[3].mxu1  ;;  %v496_v48 = vmax.f32 %v488_v41, 0.0 }
 0x1c9   : > { %v483_v47 = vadd.f32 %v695_v39, %v482_v46  ;;  %v494_v50 = vmax.f32 %v480_v43, 0.0 }
 0x1ca   : > { %v497_v49 = vmax.f32 %v491_v45, 0.0 }
 0x1cb   : > { %v495_v51 = vmax.f32 %v483_v47, 0.0 }
 0x1cc   : > { %v499_v52 = vpack.c.bf16 %v497_v49, %v496_v48 }
 0x1cd   : > { %v498_v53 = vpack.c.bf16 %v495_v51, %v494_v50 }
 0x1cf   : > { %783 = vmatprep.mubr.bf16.mxu0 %v498_v53 }
 0x1d0   : > { %784 = vmatmul.mubr.bf16.vlgmr.msra.gmra.mrb[4].mxu0 %v499_v52 }
 0x2a3   : > { %v785_v55 = vpop.f32.mrb[4].mxu0 }
 0x2a4   : > { %v605_v56 = vpop.f32.mrb[5].mxu0  ;;  %v614_v61 = vadd.f32 %v785_v55, %v704_v54 }
 0x2a5   : > { %v606_v57 = vadd.f32 %v704_v54, %v605_v56  ;;  %v786_v58 = vpop.f32.mrb[6].mxu0 }
 0x2a6   : > { %v608_v59 = vpop.f32.mrb[7].mxu0  ;;  %v617_v62 = vadd.f32 %v786_v58, %v704_v54  ;;  %623 = vst.msk [vmem:[%s280_s11 + $0x10] sm:$0xff] %vm620_vm1, %v614_v61 }
 0x2a7   : > { %621 = vst.msk [vmem:[%s280_s11] sm:$0xff] %vm620_vm1, %v606_v57  ;;  %v609_v60 = vadd.f32 %v704_v54, %v608_v59 }
 0x2a8   : > { %624 = vst.msk [vmem:[%s280_s11 + $0x18] sm:$0xff] %vm620_vm1, %v617_v62 }
 0x2a9   : > { %622 = vst.msk [vmem:[%s280_s11 + $0x8] sm:$0xff] %vm620_vm1, %v609_v60 }
 0x2aa PF: > { %s17_s24 = sadd.s32 1, %s819_s24  }
 0x2ab   : > { %p14_p4 = scmp.ge.s32.totalorder %s17_s24, 4  }
 0x2ad   :  { %16 = sbr.rel (!%p14_p4) target bundleno = 1 (0x1), region = 78 }

</bundles_post_ra>
